<compile_context>
chip_gen: v6e
topology: v6e:2x2x1
jax: 0.10.0
libtpu: 0.0.40
codegen_flags: <defaults>
</compile_context>

<pallas_src>
import functools

import jax
import jax.numpy as jnp
from jax.experimental import pallas as pl
from jax.experimental.pallas import tpu as pltpu


def _round_up(n, m):
    return ((n + m - 1) // m) * m


def _cat_embedding_kernel(x_ref, w_ref, o_ref, *, offsets):
    """x_ref: (tile_b, n_cols) int32 indices.
    w_ref: (K_pad, total_dim) block-diagonal packed embedding tables.
    o_ref: (tile_b, total_dim) concatenated embeddings."""
    xb = x_ref[...]                                    # load indices once
    tile_b, n_cols = xb.shape
    k_pad, _ = w_ref.shape

    iota = jax.lax.broadcasted_iota(jnp.int32, (tile_b, k_pad), 1)

    # Multi-hot over the packed vocab axis: column i selects row
    # offsets[i] + idx_i of the block-diagonal table.
    multihot = (iota == (xb[:, 0:1] + offsets[0])).astype(w_ref.dtype)
    for i in range(1, n_cols):
        multihot = multihot + (iota == (xb[:, i:i + 1] + offsets[i])).astype(
            w_ref.dtype)

    # One MXU push (K = K_pad, N = total_dim) does all lookups and the concat;
    # single full-width store (no masked narrow vst per column).
    o_ref[...] = jnp.dot(multihot, w_ref[...],
                         preferred_element_type=jnp.float32).astype(o_ref.dtype)


def categorical_embedding(x, tables, *, max_batch_tile=8192):
    """Pallas equivalent of CategoricalEmbedding.forward.

    x:      (B, n_cols) integer indices.
    tables: list of (vocab_i, dim_i) float arrays (the nn.Embedding weights).
    returns (B, sum(dim_i)) concatenated embeddings.
    """
    B, n_cols = x.shape
    assert n_cols == len(tables)
    vocabs = [int(t.shape[0]) for t in tables]
    dims = [int(t.shape[1]) for t in tables]
    total_dim = sum(dims)
    out_dtype = tables[0].dtype

    # Pack all tables into one block-diagonal (K_pad, total_dim) weight.
    # table_i occupies rows [off_i, off_i + vocab_i), cols [col_i, col_i + dim_i).
    k_pad = max(128, _round_up(sum(vocabs), 128))
    packed = jnp.zeros((k_pad, total_dim), out_dtype)
    offsets = []
    r = c = 0
    for t, v, d in zip(tables, vocabs, dims):
        offsets.append(r)
        packed = packed.at[r:r + v, c:c + d].set(t.astype(out_dtype))
        r += v
        c += d
    offsets = tuple(offsets)

    # Batch tile: as large as sensible (amortize per-step overhead), multiple
    # of 8 (sublane rule), but >= 2 grid steps when B allows so v7x's second
    # TensorCore gets work on the "parallel" batch axis.
    tile_b = max(8, min(max_batch_tile, _round_up(pl.cdiv(B, 2), 8)))
    grid = (pl.cdiv(B, tile_b),)

    kernel = functools.partial(_cat_embedding_kernel, offsets=offsets)

    flops = 2 * B * k_pad * total_dim
    bytes_accessed = (
        x.size * 4
        + int(packed.size) * packed.dtype.itemsize
        + B * total_dim * jnp.dtype(out_dtype).itemsize
    )

    return pl.pallas_call(
        kernel,
        out_shape=jax.ShapeDtypeStruct((B, total_dim), out_dtype),
        grid_spec=pltpu.PrefetchScalarGridSpec(
            num_scalar_prefetch=0,
            grid=grid,
            in_specs=[
                pl.BlockSpec((tile_b, n_cols), lambda i: (i, 0)),
                # Packed table is grid-invariant and stays VMEM-resident.
                pl.BlockSpec((k_pad, total_dim), lambda i: (0, 0)),
            ],
            out_specs=pl.BlockSpec((tile_b, total_dim), lambda i: (i, 0)),
        ),
        compiler_params=pltpu.CompilerParams(
            dimension_semantics=("parallel",),
            # Headroom for the (tile_b, 128) multi-hot intermediate plus
            # double-buffered index/output blocks; below physical VMEM on
            # v5e (128 MiB), v6e (128 MiB) and v7x (64 MiB).
            vmem_limit_bytes=48 * 1024 * 1024,
        ),
        cost_estimate=pl.CostEstimate(
            flops=flops, transcendentals=0, bytes_accessed=bytes_accessed),
    )(x.astype(jnp.int32), packed)


def categorical_embedding_ref(x, tables):
    # pure-JAX reference (matches torch.cat([emb_i(x[:, i])], dim=1))
    return jnp.concatenate(
        [jnp.take(t, x[:, i], axis=0) for i, t in enumerate(tables)], axis=1)


if __name__ == "__main__":
    key = jax.random.PRNGKey(0)

    # Mirrors the PyTorch spec: one table per categorical column,
    # embedding_dims = int(sqrt(input_size) // 2).
    input_sizes = [50, 30, 20, 10]                     # Main, Sub1, Sub2, Sub3
    embedding_dims = [int(float(s) ** 0.5 // 2) for s in input_sizes]  # [3,2,2,1]

    keys = jax.random.split(key, 3 * len(input_sizes))
    tables = [
        jax.random.normal(keys[i], (v, d), dtype=jnp.float32)
        for i, (v, d) in enumerate(zip(input_sizes, embedding_dims))
    ]

    # Small primary check (batch = 8).
    batch = 8
    cols = [
        jax.random.randint(keys[len(input_sizes) + i], (batch,), 0, v,
                           dtype=jnp.int32)
        for i, v in enumerate(input_sizes)
    ]
    x = jnp.stack(cols, axis=1)                        # (8, 4) int32 indices

    y = categorical_embedding(x, tables)
    jax.block_until_ready(y)
    y_ref = categorical_embedding_ref(x, tables)
    assert y.shape == (batch, sum(embedding_dims))
    assert y.dtype == jnp.float32
    assert jnp.allclose(y, y_ref, atol=1e-6, rtol=1e-6)

    # Secondary check exercising a multi-step grid with a ragged last block.
    batch2 = 37
    cols2 = [
        jax.random.randint(keys[2 * len(input_sizes) + i], (batch2,), 0, v,
                           dtype=jnp.int32)
        for i, v in enumerate(input_sizes)
    ]
    x2 = jnp.stack(cols2, axis=1)
    y2 = categorical_embedding(x2, tables)
    jax.block_until_ready(y2)
    assert jnp.allclose(y2, categorical_embedding_ref(x2, tables),
                        atol=1e-6, rtol=1e-6)

    print("KERNEL_OK")
</pallas_src>

<mosaic_0001>
module attributes {stable_mosaic.version = 11 : i64} {
  func.func @_cat_embedding_kernel(%arg0: i32, %arg1: memref<8x4xi32, #tpu.memory_space<vmem>>, %arg2: memref<128x8xf32, #tpu.memory_space<vmem>>, %arg3: memref<8x8xf32, #tpu.memory_space<vmem>>) attributes {dimension_semantics = [#tpu.dimension_semantics<parallel>], iteration_bounds = array<i64: 1>, scalar_prefetch = 0 : i64, scratch_operands = 0 : i64, tpu.core_type = #tpu.core_type<tc>, window_params = [{transform_indices = @transform_0, window_bounds = array<i64: 8, 4>}, {pipeline_mode = #tpu.pipeline_mode<synchronous>, transform_indices = @transform_1, window_bounds = array<i64: 128, 8>}, {transform_indices = @transform_2, window_bounds = array<i64: 8, 8>}]} {
    %c0 = arith.constant 0 : index
    %c0_0 = arith.constant 0 : index
    %0 = vector.load %arg1[%c0, %c0_0] : memref<8x4xi32, #tpu.memory_space<vmem>>, vector<8x4xi32>
    %1 = tpu.iota {dimensions = array<i32: 1>} : vector<8x128xi32>
    %2 = vector.extract_strided_slice %0 {offsets = [0, 0], sizes = [8, 1], strides = [1, 1]} : vector<8x4xi32> to vector<8x1xi32>
    %c0_i32 = arith.constant 0 : i32
    %3 = vector.broadcast %c0_i32 : i32 to vector<8x1xi32>
    %4 = arith.addi %2, %3 : vector<8x1xi32>
    %5 = vector.broadcast %4 : vector<8x1xi32> to vector<8x128xi32>
    %6 = arith.cmpi eq, %1, %5 : vector<8x128xi32>
    %7 = arith.extui %6 : vector<8x128xi1> to vector<8x128xi32>
    %8 = arith.sitofp %7 : vector<8x128xi32> to vector<8x128xf32>
    %9 = vector.extract_strided_slice %0 {offsets = [0, 1], sizes = [8, 1], strides = [1, 1]} : vector<8x4xi32> to vector<8x1xi32>
    %c50_i32 = arith.constant 50 : i32
    %10 = vector.broadcast %c50_i32 : i32 to vector<8x1xi32>
    %11 = arith.addi %9, %10 : vector<8x1xi32>
    %12 = vector.broadcast %11 : vector<8x1xi32> to vector<8x128xi32>
    %13 = arith.cmpi eq, %1, %12 : vector<8x128xi32>
    %14 = arith.extui %13 : vector<8x128xi1> to vector<8x128xi32>
    %15 = arith.sitofp %14 : vector<8x128xi32> to vector<8x128xf32>
    %16 = arith.addf %8, %15 : vector<8x128xf32>
    %17 = vector.extract_strided_slice %0 {offsets = [0, 2], sizes = [8, 1], strides = [1, 1]} : vector<8x4xi32> to vector<8x1xi32>
    %c80_i32 = arith.constant 80 : i32
    %18 = vector.broadcast %c80_i32 : i32 to vector<8x1xi32>
    %19 = arith.addi %17, %18 : vector<8x1xi32>
    %20 = vector.broadcast %19 : vector<8x1xi32> to vector<8x128xi32>
    %21 = arith.cmpi eq, %1, %20 : vector<8x128xi32>
    %22 = arith.extui %21 : vector<8x128xi1> to vector<8x128xi32>
    %23 = arith.sitofp %22 : vector<8x128xi32> to vector<8x128xf32>
    %24 = arith.addf %16, %23 : vector<8x128xf32>
    %25 = vector.extract_strided_slice %0 {offsets = [0, 3], sizes = [8, 1], strides = [1, 1]} : vector<8x4xi32> to vector<8x1xi32>
    %c100_i32 = arith.constant 100 : i32
    %26 = vector.broadcast %c100_i32 : i32 to vector<8x1xi32>
    %27 = arith.addi %25, %26 : vector<8x1xi32>
    %28 = vector.broadcast %27 : vector<8x1xi32> to vector<8x128xi32>
    %29 = arith.cmpi eq, %1, %28 : vector<8x128xi32>
    %30 = arith.extui %29 : vector<8x128xi1> to vector<8x128xi32>
    %31 = arith.sitofp %30 : vector<8x128xi32> to vector<8x128xf32>
    %32 = arith.addf %24, %31 : vector<8x128xf32>
    %c0_1 = arith.constant 0 : index
    %c0_2 = arith.constant 0 : index
    %33 = vector.load %arg2[%c0_1, %c0_2] : memref<128x8xf32, #tpu.memory_space<vmem>>, vector<128x8xf32>
    %cst = arith.constant dense<0.000000e+00> : vector<8x8xf32>
    %34 = tpu.matmul %32, %33, %cst {dimension_numbers = #tpu.dot_dimension_numbers<[1], [0], [0], [1], [0, 0, 1, 1], [], []>} : vector<8x128xf32>, vector<128x8xf32>, vector<8x8xf32> -> vector<8x8xf32>
    %c0_3 = arith.constant 0 : index
    %c0_4 = arith.constant 0 : index
    %35 = vector.load %arg3[%c0_3, %c0_4] : memref<8x8xf32, #tpu.memory_space<vmem>>, vector<8x8xf32>
    tpu.vector_store %arg3[%c0_3, %c0_4], %34 {strides = array<i32>} : memref<8x8xf32, #tpu.memory_space<vmem>>, vector<8x8xf32>,
    return
  }
  func.func @transform_0(%arg0: i32) -> (i32, i32) {
    %c0_i32 = arith.constant 0 : i32
    %c0_i32_0 = arith.constant 0 : i32
    return %arg0, %c0_i32 : i32, i32
  }
  func.func @transform_1(%arg0: i32) -> (i32, i32) {
    %c0_i32 = arith.constant 0 : i32
    %c0_i32_0 = arith.constant 0 : i32
    %c0_i32_1 = arith.constant 0 : i32
    return %c0_i32, %c0_i32_0 : i32, i32
  }
  func.func @transform_2(%arg0: i32) -> (i32, i32) {
    %c0_i32 = arith.constant 0 : i32
    %c0_i32_0 = arith.constant 0 : i32
    return %arg0, %c0_i32 : i32, i32
  }
}

</mosaic_0001>

<bundles_post_ra>
// kernel: tpu_custom_call.1
= control target key start
LH: loop header
LB: loop body
LE: loop exit
PB: predicated region body
PF: predicated region fallthrough
CT: control target
= control target key end

     0   :  { %v237_v2 = vmov 0   ;;  %v238_v3 = vmov 2   ;;  %v239_v5 = vmov 0.0   ;;  %s334_s0 = inlined_call_operand.vmem [shape: s32[8,4], index: 0, kind: input, shape index: {}]   ;;  %s335_s1 = inlined_call_operand.vmem [shape: f32[128,8], index: 1, kind: input, shape index: {}]   ;;  %s336_s2 = inlined_call_operand.hbm [shape: f32[8,8], index: 2, kind: output, shape index: {}]  }
   0x1   :  { %v12_v0 = vld [vmem:[%s334_s0] sm:$0xff]  ;;  %v60_v1 = vld [vmem:[%s335_s1 + $0x78] sm:$0xff]  ;;  %210 = vset.pattern.permute.xlu0 %v237_v2  ;;  %212 = vset.pattern.permute.xlu1 %v238_v3  ;;  %v59_v6 = vld [vmem:[%s335_s1 + $0x70] sm:$0xff] }
   0x2   :  { %v29_v4 = vadd.s32 80, %v12_v0  ;;  %16 = vperm.xlu0 %210, %v12_v0   ;;  %168 = vmatprep.subr.mxu0 %v239_v5  ;;  %v21_v7 = vadd.s32 50, %v12_v0  ;;  %v37_v8 = vadd.s32 100, %v12_v0  ;;  %v58_v9 = vld [vmem:[%s335_s1 + $0x68] sm:$0xff] }
   0x3   :  { %169 = vmatpush3.msra.mxu0 %v60_v1 }
   0x4   :  { %31 = vperm.xlu1 %212, %v29_v4   ;;  %170 = vmatprep.subr.mxu0 %v239_v5 }
   0x5   :  { %171 = vmatpush3.msra.mxu0 %v59_v6 }
   0x6   :  { %7 = vsyncpa [#allocation3], 0  ;;  %v240_v10 = vmov 1   ;;  %172 = vmatprep.subr.mxu0 %v239_v5  ;;  %v241_v11 = vmov 3   ;;  %v57_v12 = vld [vmem:[%s335_s1 + $0x60] sm:$0xff]  ;;  %v56_v13 = vld [vmem:[%s335_s1 + $0x58] sm:$0xff]  ;;  %v13_v25 = vlaneseq }
   0x7   :  { %211 = vset.pattern.permute.xlu0 %v240_v10  ;;  %173 = vmatpush3.msra.mxu0 %v58_v9  ;;  %vm242_vm0 = vmmov 0   ;;  %v55_v14 = vld [vmem:[%s335_s1 + $0x50] sm:$0xff]  ;;  %v54_v15 = vld [vmem:[%s335_s1 + $0x48] sm:$0xff]  ;;  %v53_v16 = vld [vmem:[%s335_s1 + $0x40] sm:$0xff]  ;;  %vm131_vm5 = vcmask 64512  }
   0x8   :  { %23 = vperm.xlu0 %211, %v21_v7   ;;  %213 = vset.pattern.permute.xlu1 %v241_v11  ;;  %v52_v17 = vld [vmem:[%s335_s1 + $0x38] sm:$0xff]  ;;  %v51_v18 = vld [vmem:[%s335_s1 + $0x30] sm:$0xff]  ;;  %v50_v19 = vld [vmem:[%s335_s1 + $0x28] sm:$0xff]  ;;  %v14_v26 = vand.u32 127, %v13_v25 }
   0x9   :  { %39 = vperm.xlu1 %213, %v37_v8   ;;  %174 = vmatprep.subr.mxu0 %v239_v5  ;;  %v49_v20 = vld [vmem:[%s335_s1 + $0x20] sm:$0xff]  ;;  %v48_v21 = vld [vmem:[%s335_s1 + $0x18] sm:$0xff]  ;;  %v47_v22 = vld [vmem:[%s335_s1 + $0x10] sm:$0xff] }
   0xa   :  { %175 = vmatpush3.msra.mxu0 %v57_v12  ;;  %200 = vmatprep.mubr.msk.f32.mxu0 %vm242_vm0, %v239_v5  ;;  %v46_v23 = vld [vmem:[%s335_s1 + $0x8] sm:$0xff]  ;;  %v45_v24 = vld [vmem:[%s335_s1] sm:$0xff]  ;;  %s243_s1 = smov [#allocation2]  }
   0xb   :  { %176 = vmatprep.subr.mxu0 %v239_v5  ;;  %s139_s14 = sshll.u32 %s243_s1, 4  ;;  %s140_s14 = int_to_ptr.vmem [resolvable:$true] %s139_s14 }
   0xc   :  { %214 = vset.pattern.permute.xlu0 %v241_v11  ;;  %177 = vmatpush3.msra.mxu0 %v56_v13  ;;  %s215_s0 = scalar_lea.vmem %s140_s14, 128  ;;  %p220_p1 = scmp.lt.s32.totalorder %s140_s14, %s140_s14 }
   0xd   :  { %178 = vmatprep.subr.mxu0 %v239_v5  ;;  %p216_p0 = scmp.ne.s32.totalorder %s140_s14, %s215_s0  ;;  %p221_p2 = scmp.lt.s32.totalorder %s215_s0, %s215_s0 }
   0xe   :  { %179 = vmatpush3.msra.mxu0 %v55_v14 }
   0xf   :  { %180 = vmatprep.subr.mxu0 %v239_v5  ;;  %p222_p3 = por %p221_p2, %p220_p1 }
  0x10   :  { %181 = vmatpush3.msra.mxu0 %v54_v15 }
  0x11   :  { %182 = vmatprep.subr.mxu0 %v239_v5  ;;  %p223_p4 = pnand %p222_p3, %p216_p0 }
  0x12   :  { %183 = vmatpush3.msra.mxu0 %v53_v16 }
  0x13   :  { %184 = vmatprep.subr.mxu0 %v239_v5 }
  0x14   :  { %185 = vmatpush3.msra.mxu0 %v52_v17 }
  0x15   :  { %186 = vmatprep.subr.mxu0 %v239_v5 }
  0x16   :  { %187 = vmatpush3.msra.mxu0 %v51_v18 }
  0x17   :  { %188 = vmatprep.subr.mxu0 %v239_v5 }
  0x18   :  { %189 = vmatpush3.msra.mxu0 %v50_v19 }
  0x19   :  { %190 = vmatprep.subr.mxu0 %v239_v5 }
  0x1a   :  { %191 = vmatpush3.msra.mxu0 %v49_v20 }
  0x1b   :  { %192 = vmatprep.subr.mxu0 %v239_v5 }
  0x1c   :  { %193 = vmatpush3.msra.mxu0 %v48_v21 }
  0x1d   :  { %194 = vmatprep.subr.mxu0 %v239_v5 }
  0x1e   :  { %195 = vmatpush3.msra.mxu0 %v47_v22 }
  0x1f   :  { %196 = vmatprep.subr.mxu0 %v239_v5 }
  0x20   :  { %197 = vmatpush3.msra.mxu0 %v46_v23 }
  0x21   :  { %198 = vmatprep.subr.mxu0 %v239_v5 }
  0x22   :  { %199 = vmatpush3.msra.mxu0 %v45_v24 }
  0x7d   :  { %v17_v27 = vpop.permute.xlu0 %16 }
  0x7e   :  { %vm18_vm1 = vcmp.eq.s32.totalorder %v14_v26, %v17_v27 }
  0x7f   :  { %v32_v28 = vpop.permute.xlu1 %31  ;;  %v147_v31 = vsel %vm18_vm1, 1.0, %v239_v5 }
  0x80   :  { %vm33_vm2 = vcmp.eq.s32.totalorder %v14_v26, %v32_v28 }
  0x81   :  { %v149_v34 = vsel %vm33_vm2, 1.0, %v239_v5 }
  0x83   :  { %v24_v29 = vpop.permute.xlu0 %23 }
  0x84   :  { %vm25_vm3 = vcmp.eq.s32.totalorder %v14_v26, %v24_v29  ;;  %v40_v30 = vpop.permute.xlu1 %39 }
  0x85   :  { %v148_v32 = vsel %vm25_vm3, 1.0, %v239_v5  ;;  %vm41_vm4 = vcmp.eq.s32.totalorder %v14_v26, %v40_v30 }
  0x86   :  { %v28_v33 = vadd.f32 %v148_v32, %v147_v31  ;;  %v150_v35 = vsel %vm41_vm4, 1.0, %v239_v5 }
  0x88   :  { %v36_v36 = vadd.f32 %v149_v34, %v28_v33 }
  0x8a   :  { %v44_v37 = vadd.f32 %v150_v35, %v36_v36 }
  0x8c   :  { %201 = vmatmul.mubr.f32.vlgmr.msra.gmra.mxu0 %v44_v37 }
 0x14c   :  { %v127_v38 = vpop.f32.mrf.mxu0 }
 0x14d   :  { %132 = vst.msk [vmem:[#allocation2] sm:$0xff] %vm131_vm5, %v127_v38 }
 0x14e   :  { %v202_v39 = vpop.f32.mrf.mxu0 }
 0x14f   :  { %226 = shalt.err (!%p223_p4)
}
 0x150   :  { %142 = dma.vmem_to_hbm [thread:$0]  %s140_s14, 128, %s336_s2, [#allocation3]  }
 0x151   :  { %235 = dma.done.wait [#allocation3], 128  }
 0x152   :  { %236 = vsyncadd [#allocation3], 4294967168 }
 0x153   :  { %146 = vsyncpa [#allocation3], 1 }

</bundles_post_ra>
